<compile_context>
chip_gen: v7x
topology: tpu7x:2x2x1
jax: 0.10.0
libtpu: 0.0.40
codegen_flags: <defaults>
</compile_context>

<pallas_src>
import functools

import jax
import jax.numpy as jnp
from jax.experimental import pallas as pl
from jax.experimental.pallas import tpu as pltpu

EPS = 1e-5


# --------------------------- VMEM / block budgets ----------------------------
def _vmem_budget():
    """Returns (stream_block_cap, stream_vmem_limit, fused_x_cap, fused_vmem_limit)."""
    # Conservative defaults are safe on every generation (v7x has only 64 MiB VMEM).
    blk_cap, stream_vmem = 4 << 20, 40 << 20
    fuse_cap, fuse_vmem = 4 << 20, 40 << 20
    try:  # On v5e/v6e (128 MiB physical VMEM) allow bigger blocks / scoped limit.
        info = pltpu.get_tpu_info()
        if int(getattr(info, "vmem_capacity_bytes", 0)) >= (96 << 20):
            blk_cap, stream_vmem = 8 << 20, 64 << 20
            fuse_cap, fuse_vmem = 10 << 20, 80 << 20
    except Exception:
        pass
    return blk_cap, stream_vmem, fuse_cap, fuse_vmem


# ----------------------------- fused (resident) ------------------------------
def _fused_kernel(scal_ref, w_ref, x_ref, o_ref):
    # scal_ref: SMEM (4,)  [alpha, linear_bias, use_transform_flag, 1/HW (unused here)]
    # w_ref:    (1, C, 1)  Linear(planes, 1) weight
    # x_ref:    (N, C, HW) input, fully resident in VMEM
    x = x_ref[...].astype(jnp.float32)                       # (N, C, HW)

    mu_in = jnp.mean(x, axis=-1, keepdims=True)              # (N, C, 1)
    xc = x - mu_in
    var_in = jnp.mean(xc * xc, axis=-1, keepdims=True)       # centered (better numerics)

    mu_bn = jnp.mean(mu_in, axis=0, keepdims=True)           # (1, C, 1)
    ex2_bn = jnp.mean(var_in + mu_in * mu_in, axis=0, keepdims=True)
    var_bn = jnp.maximum(ex2_bn - mu_bn * mu_bn, 0.0)

    # Domain_transform: Linear(C -> 1) on pooled feats, ReLU, mean over batch (tiny, VPU).
    lin = jnp.sum(mu_in * w_ref[...], axis=1, keepdims=True) + scal_ref[1]   # (N, 1, 1)
    dom = jnp.mean(jnp.maximum(lin, 0.0), axis=0, keepdims=True)             # (1, 1, 1)
    z = scal_ref[0] + 0.01 * dom * scal_ref[2]
    t = 1.0 / (1.0 + jnp.exp(-z))                            # sigmoid (EUP-friendly)

    a = jax.lax.rsqrt(var_in + EPS)                          # (N, C, 1)
    b = jax.lax.rsqrt(var_bn + EPS)                          # (1, C, 1)
    scale = t * a + (1.0 - t) * b
    shift = t * a * mu_in + (1.0 - t) * b * mu_bn
    o_ref[...] = (x * scale - shift).astype(o_ref.dtype)


# --------------------- Pass 1: per-(n,c) sum / sumsq over HW -----------------
def _stats_kernel(x_ref, sum_ref, sq_ref):
    # x_ref: (rt, ht);  sum_ref/sq_ref: (rt, 1) f32 resident accumulators over the HW axis
    @pl.when(pl.program_id(1) == 0)
    def _init():
        sum_ref[...] = jnp.zeros_like(sum_ref)
        sq_ref[...] = jnp.zeros_like(sq_ref)

    xb = x_ref[...].astype(jnp.float32)
    sum_ref[...] += jnp.sum(xb, axis=-1, keepdims=True)
    sq_ref[...] += jnp.sum(xb * xb, axis=-1, keepdims=True)


# ------------------- Pass 3: apply  out = x * scale - shift ------------------
def _apply_kernel(x_ref, scale_ref, shift_ref, o_ref):
    xb = x_ref[...].astype(jnp.float32)
    o_ref[...] = (xb * scale_ref[...] - shift_ref[...]).astype(o_ref.dtype)


# ------------------------------- tile selection ------------------------------
def _pick_hw_tile(hw, block_cap):
    """Largest multiple-of-128 divisor of hw that keeps an 8-row block under block_cap."""
    max_elems = max(128, block_cap // (4 * 8))
    best, t = 0, 128
    while t <= min(hw, max_elems):
        if hw % t == 0:
            best = t
        t += 128
    return best if best else hw          # fallback: full spatial extent (legal block)


def _pick_row_tile(nc, ht, block_cap):
    """Largest multiple-of-8 divisor of nc under the byte cap, preferring >=8 (else >=2)
    row blocks so the 'parallel' row axis can be split across both v7x TensorCores."""
    max_rows = max(8, block_cap // (4 * ht))
    cands = [d for d in range(8, nc + 1, 8) if nc % d == 0]

    def pick(min_blocks):
        best = 0
        for d in cands:
            if d <= max_rows and nc // d >= min_blocks:
                best = max(best, d)
        return best

    rt = pick(8) or pick(2) or pick(1)
    return rt if rt else nc              # nc < 8 (or no mult-of-8 divisor): full extent


# ---------------------------------- wrapper ----------------------------------
@functools.partial(jax.jit,
                   static_argnames=("use_transform", "force_streaming", "hw_tile", "row_tile"))
def an_forward(x_nchw, alpha, lin_w, lin_b, use_transform=True,
               force_streaming=False, hw_tile=None, row_tile=None):
    """x_nchw: (N, C, H, W); lin_w: (1, C); lin_b: (1,); alpha: scalar."""
    N, C, H, W = x_nchw.shape
    HW = H * W
    NC = N * C
    out_dtype = x_nchw.dtype

    blk_cap, stream_vmem, fuse_cap, fuse_vmem = _vmem_budget()

    scal = jnp.stack([
        jnp.asarray(alpha, jnp.float32).reshape(()),
        jnp.asarray(lin_b, jnp.float32).reshape(()),
        jnp.asarray(1.0 if use_transform else 0.0, jnp.float32),
        jnp.asarray(1.0 / HW, jnp.float32),
    ])
    w32 = lin_w.astype(jnp.float32).reshape(1, C)

    # ---------------- fused path: whole activation resident in VMEM ----------------
    if (not force_streaming) and NC * HW * 4 <= fuse_cap:
        out = pl.pallas_call(
            _fused_kernel,
            out_shape=jax.ShapeDtypeStruct((N, C, HW), out_dtype),
            in_specs=[
                pl.BlockSpec(memory_space=pltpu.MemorySpace.SMEM),   # scalars
                pl.BlockSpec(memory_space=pltpu.MemorySpace.VMEM),   # linear weight
                pl.BlockSpec(memory_space=pltpu.MemorySpace.VMEM),   # x (resident)
            ],
            out_specs=pl.BlockSpec(memory_space=pltpu.MemorySpace.VMEM),
            compiler_params=pltpu.CompilerParams(vmem_limit_bytes=fuse_vmem),
        )(scal, w32.reshape(1, C, 1), x_nchw.reshape(N, C, HW))
        return out.reshape(N, C, H, W)

    # ---------------- streaming path: stats -> derive (jnp) -> apply ----------------
    x2 = x_nchw.reshape(NC, HW)
    ht = hw_tile if hw_tile is not None else _pick_hw_tile(HW, blk_cap)
    rt = row_tile if row_tile is not None else _pick_row_tile(NC, ht, blk_cap)
    assert HW % ht == 0 and NC % rt == 0
    grid = (NC // rt, HW // ht)
    block_bytes = rt * ht * 4
    # Pass 3 double-buffers input and output (~4x block); keep headroom. For typical
    # blocks this stays at stream_vmem (<= 48/64 MiB); only pathological full-extent
    # fallbacks can push it higher.
    vmem_limit = int(max(stream_vmem, 4 * block_bytes + (8 << 20)))

    # Pass 1: per-row (n*c) sum & sum-of-squares over the spatial axis.
    sums, sqs = pl.pallas_call(
        _stats_kernel,
        out_shape=(jax.ShapeDtypeStruct((NC, 1), jnp.float32),
                   jax.ShapeDtypeStruct((NC, 1), jnp.float32)),
        grid=grid,
        in_specs=[pl.BlockSpec((rt, ht), lambda r, k: (r, k))],
        out_specs=(pl.BlockSpec((rt, 1), lambda r, k: (r, 0)),
                   pl.BlockSpec((rt, 1), lambda r, k: (r, 0))),
        compiler_params=pltpu.CompilerParams(
            dimension_semantics=("parallel", "arbitrary"),
            vmem_limit_bytes=vmem_limit),
    )(x2)

    # Derive per-(n,c) scale/shift in plain jnp (O(N*C), fused by XLA — no extra
    # kernel launch).  Single-pass variance E[x^2]-mu^2, clamped at 0.
    # TODO(synk): E[x^2]-mu^2 can cancel catastrophically for strongly biased inputs.
    inv_hw = jnp.float32(1.0 / HW)
    mu_in = sums.reshape(N, C) * inv_hw
    ex2_in = sqs.reshape(N, C) * inv_hw
    var_in = jnp.maximum(ex2_in - mu_in * mu_in, 0.0)
    mu_bn = jnp.mean(mu_in, axis=0, keepdims=True)
    ex2_bn = jnp.mean(ex2_in, axis=0, keepdims=True)
    var_bn = jnp.maximum(ex2_bn - mu_bn * mu_bn, 0.0)
    lin = mu_in @ w32.T + scal[1]                           # (N, 1)
    dom = jnp.mean(jnp.maximum(lin, 0.0))
    flag = 1.0 if use_transform else 0.0
    t = jax.nn.sigmoid(scal[0] + 0.01 * dom * flag)
    a = jax.lax.rsqrt(var_in + EPS)
    b = jax.lax.rsqrt(var_bn + EPS)
    scale = (t * a + (1.0 - t) * b).reshape(NC, 1)
    shift = (t * a * mu_in + (1.0 - t) * b * mu_bn).reshape(NC, 1)

    # Pass 3: single FMA per element, lane-dense output blocks, fully parallel grid.
    out = pl.pallas_call(
        _apply_kernel,
        out_shape=jax.ShapeDtypeStruct((NC, HW), out_dtype),
        grid=grid,
        in_specs=[pl.BlockSpec((rt, ht), lambda r, k: (r, k)),
                  pl.BlockSpec((rt, 1), lambda r, k: (r, 0)),
                  pl.BlockSpec((rt, 1), lambda r, k: (r, 0))],
        out_specs=pl.BlockSpec((rt, ht), lambda r, k: (r, k)),
        compiler_params=pltpu.CompilerParams(
            dimension_semantics=("parallel", "parallel"),
            vmem_limit_bytes=vmem_limit),
    )(x2, scale, shift)
    return out.reshape(N, C, H, W)


# --------------------------------- reference ---------------------------------
def an_reference(x, alpha, lin_w, lin_b, use_transform=True):
    """Plain-JAX reference mirroring the PyTorch forward (training-mode BN)."""
    mu_in = jnp.mean(x, axis=(2, 3), keepdims=True)
    var_in = jnp.mean((x - mu_in) ** 2, axis=(2, 3), keepdims=True)
    out_in = (x - mu_in) / jnp.sqrt(var_in + EPS)
    mu_bn = jnp.mean(x, axis=(0, 2, 3), keepdims=True)
    var_bn = jnp.mean((x - mu_bn) ** 2, axis=(0, 2, 3), keepdims=True)
    out_bn = (x - mu_bn) / jnp.sqrt(var_bn + EPS)
    pooled = jnp.mean(x, axis=(2, 3))                        # (N, C)
    lin = pooled @ lin_w.T + lin_b                           # (N, 1)
    dom = jnp.mean(jax.nn.relu(lin))
    flag = 1.0 if use_transform else 0.0
    t = jax.nn.sigmoid(alpha + 0.01 * dom * flag)
    return t * out_in + (1.0 - t) * out_bn


if __name__ == "__main__":
    key = jax.random.PRNGKey(0)
    N, C, H, W = 2, 4, 16, 16   # planes = 4

    kx, kw, kb = jax.random.split(key, 3)
    x = jax.random.normal(kx, (N, C, H, W), dtype=jnp.float32)

    # Parameters: nn.Linear(planes, 1) weight/bias, alpha = 0.
    bound = 1.0 / (C ** 0.5)
    lin_w = jax.random.uniform(kw, (1, C), minval=-bound, maxval=bound, dtype=jnp.float32)
    lin_b = jax.random.uniform(kb, (1,), minval=-bound, maxval=bound, dtype=jnp.float32)
    alpha = jnp.float32(0.0)

    ref_t = an_reference(x, alpha, lin_w, lin_b, use_transform=True)
    ref_f = an_reference(x, alpha, lin_w, lin_b, use_transform=False)

    # 1) Fused (VMEM-resident) path, transform on.
    out = jax.block_until_ready(an_forward(x, alpha, lin_w, lin_b, use_transform=True))
    assert out.shape == (N, C, H, W)
    assert jnp.allclose(out, ref_t, atol=1e-4, rtol=1e-4), float(jnp.max(jnp.abs(out - ref_t)))

    # 2) Fused path, transform off (t = sigmoid(alpha)).
    out2 = jax.block_until_ready(an_forward(x, alpha, lin_w, lin_b, use_transform=False))
    assert jnp.allclose(out2, ref_f, atol=1e-4, rtol=1e-4), float(jnp.max(jnp.abs(out2 - ref_f)))

    # 3) Streaming path forced, multi-block spatial grid (exercises the HW reduction).
    out3 = jax.block_until_ready(
        an_forward(x, alpha, lin_w, lin_b, use_transform=True,
                   force_streaming=True, hw_tile=128, row_tile=8))
    assert jnp.allclose(out3, ref_t, atol=1e-4, rtol=1e-4), float(jnp.max(jnp.abs(out3 - ref_t)))

    # 4) Streaming path with automatic tile selection on a slightly larger map.
    N2, C2, H2, W2 = 4, 8, 32, 32
    k2, k3, k4 = jax.random.split(jax.random.PRNGKey(1), 3)
    x_big = jax.random.normal(k2, (N2, C2, H2, W2), dtype=jnp.float32)
    bound2 = 1.0 / (C2 ** 0.5)
    lin_w2 = jax.random.uniform(k3, (1, C2), minval=-bound2, maxval=bound2, dtype=jnp.float32)
    lin_b2 = jax.random.uniform(k4, (1,), minval=-bound2, maxval=bound2, dtype=jnp.float32)
    out4 = jax.block_until_ready(
        an_forward(x_big, alpha, lin_w2, lin_b2, use_transform=True, force_streaming=True))
    ref4 = an_reference(x_big, alpha, lin_w2, lin_b2, use_transform=True)
    assert jnp.allclose(out4, ref4, atol=1e-4, rtol=1e-4), float(jnp.max(jnp.abs(out4 - ref4)))

    print("KERNEL_OK")
</pallas_src>

<mosaic_0001>
module attributes {stable_mosaic.version = 11 : i64} {
  func.func @_fused_kernel(%arg0: memref<4xf32, #tpu.memory_space<smem>>, %arg1: memref<1x4x1xf32, #tpu.memory_space<vmem>>, %arg2: memref<2x4x256xf32, #tpu.memory_space<vmem>>, %arg3: memref<2x4x256xf32, #tpu.memory_space<vmem>>) attributes {dimension_semantics = [], scalar_prefetch = 0 : i64, scratch_operands = 0 : i64, tpu.core_type = #tpu.core_type<tc>} {
    %c0 = arith.constant 0 : index
    %c0_0 = arith.constant 0 : index
    %c0_1 = arith.constant 0 : index
    %0 = vector.load %arg2[%c0, %c0_0, %c0_1] : memref<2x4x256xf32, #tpu.memory_space<vmem>>, vector<2x4x256xf32>
    %cst = arith.constant dense<0.000000e+00> : vector<2x4xf32>
    %1 = vector.multi_reduction <add>, %0, %cst [2] : vector<2x4x256xf32> to vector<2x4xf32>
    %2 = vector.shape_cast %1 : vector<2x4xf32> to vector<2x4x1xf32>
    %cst_2 = arith.constant 2.560000e+02 : f32
    %3 = vector.broadcast %cst_2 : f32 to vector<2x4x1xf32>
    %4 = arith.divf %2, %3 : vector<2x4x1xf32>
    %5 = vector.broadcast %4 : vector<2x4x1xf32> to vector<2x4x256xf32>
    %6 = arith.subf %0, %5 : vector<2x4x256xf32>
    %7 = arith.mulf %6, %6 : vector<2x4x256xf32>
    %cst_3 = arith.constant dense<0.000000e+00> : vector<2x4xf32>
    %8 = vector.multi_reduction <add>, %7, %cst_3 [2] : vector<2x4x256xf32> to vector<2x4xf32>
    %9 = vector.shape_cast %8 : vector<2x4xf32> to vector<2x4x1xf32>
    %cst_4 = arith.constant 2.560000e+02 : f32
    %10 = vector.broadcast %cst_4 : f32 to vector<2x4x1xf32>
    %11 = arith.divf %9, %10 : vector<2x4x1xf32>
    %cst_5 = arith.constant dense<0.000000e+00> : vector<4x1xf32>
    %12 = vector.multi_reduction <add>, %4, %cst_5 [0] : vector<2x4x1xf32> to vector<4x1xf32>
    %13 = vector.shape_cast %12 : vector<4x1xf32> to vector<1x4x1xf32>
    %cst_6 = arith.constant 2.000000e+00 : f32
    %14 = vector.broadcast %cst_6 : f32 to vector<1x4x1xf32>
    %15 = arith.divf %13, %14 : vector<1x4x1xf32>
    %16 = arith.mulf %4, %4 : vector<2x4x1xf32>
    %17 = arith.addf %11, %16 : vector<2x4x1xf32>
    %cst_7 = arith.constant dense<0.000000e+00> : vector<4x1xf32>
    %18 = vector.multi_reduction <add>, %17, %cst_7 [0] : vector<2x4x1xf32> to vector<4x1xf32>
    %19 = vector.shape_cast %18 : vector<4x1xf32> to vector<1x4x1xf32>
    %cst_8 = arith.constant 2.000000e+00 : f32
    %20 = vector.broadcast %cst_8 : f32 to vector<1x4x1xf32>
    %21 = arith.divf %19, %20 : vector<1x4x1xf32>
    %22 = arith.mulf %15, %15 : vector<1x4x1xf32>
    %23 = arith.subf %21, %22 : vector<1x4x1xf32>
    %cst_9 = arith.constant 0.000000e+00 : f32
    %24 = vector.broadcast %cst_9 : f32 to vector<1x4x1xf32>
    %25 = arith.maximumf %23, %24 : vector<1x4x1xf32>
    %c0_10 = arith.constant 0 : index
    %c0_11 = arith.constant 0 : index
    %c0_12 = arith.constant 0 : index
    %26 = vector.load %arg1[%c0_10, %c0_11, %c0_12] : memref<1x4x1xf32, #tpu.memory_space<vmem>>, vector<1x4x1xf32>
    %27 = vector.broadcast %26 : vector<1x4x1xf32> to vector<2x4x1xf32>
    %28 = arith.mulf %4, %27 : vector<2x4x1xf32>
    %cst_13 = arith.constant dense<0.000000e+00> : vector<2x1xf32>
    %29 = vector.multi_reduction <add>, %28, %cst_13 [1] : vector<2x4x1xf32> to vector<2x1xf32>
    %30 = vector.shape_cast %29 : vector<2x1xf32> to vector<2x1x1xf32>
    %c1 = arith.constant 1 : index
    %31 = memref.load %arg0[%c1] : memref<4xf32, #tpu.memory_space<smem>>
    %32 = vector.broadcast %31 : f32 to vector<2x1x1xf32>
    %33 = arith.addf %30, %32 : vector<2x1x1xf32>
    %cst_14 = arith.constant 0.000000e+00 : f32
    %34 = vector.broadcast %cst_14 : f32 to vector<2x1x1xf32>
    %35 = arith.maximumf %33, %34 : vector<2x1x1xf32>
    %cst_15 = arith.constant dense<0.000000e+00> : vector<1x1xf32>
    %36 = vector.multi_reduction <add>, %35, %cst_15 [0] : vector<2x1x1xf32> to vector<1x1xf32>
    %37 = vector.shape_cast %36 : vector<1x1xf32> to vector<1x1x1xf32>
    %cst_16 = arith.constant 2.000000e+00 : f32
    %38 = vector.broadcast %cst_16 : f32 to vector<1x1x1xf32>
    %39 = arith.divf %37, %38 : vector<1x1x1xf32>
    %c0_17 = arith.constant 0 : index
    %40 = memref.load %arg0[%c0_17] : memref<4xf32, #tpu.memory_space<smem>>
    %cst_18 = arith.constant 0.00999999977 : f32
    %41 = vector.broadcast %cst_18 : f32 to vector<1x1x1xf32>
    %42 = arith.mulf %41, %39 : vector<1x1x1xf32>
    %c2 = arith.constant 2 : index
    %43 = memref.load %arg0[%c2] : memref<4xf32, #tpu.memory_space<smem>>
    %44 = vector.broadcast %43 : f32 to vector<1x1x1xf32>
    %45 = arith.mulf %42, %44 : vector<1x1x1xf32>
    %46 = vector.broadcast %40 : f32 to vector<1x1x1xf32>
    %47 = arith.addf %46, %45 : vector<1x1x1xf32>
    %cst_19 = arith.constant 0.000000e+00 : f32
    %48 = vector.broadcast %cst_19 : f32 to vector<1x1x1xf32>
    %49 = arith.subf %48, %47 : vector<1x1x1xf32>
    %50 = math.exp %49 : vector<1x1x1xf32>
    %cst_20 = arith.constant 1.000000e+00 : f32
    %51 = vector.broadcast %cst_20 : f32 to vector<1x1x1xf32>
    %52 = arith.addf %51, %50 : vector<1x1x1xf32>
    %cst_21 = arith.constant 1.000000e+00 : f32
    %53 = vector.broadcast %cst_21 : f32 to vector<1x1x1xf32>
    %54 = arith.divf %53, %52 : vector<1x1x1xf32>
    %cst_22 = arith.constant 9.99999974E-6 : f32
    %55 = vector.broadcast %cst_22 : f32 to vector<2x4x1xf32>
    %56 = arith.addf %11, %55 : vector<2x4x1xf32>
    %57 = math.rsqrt %56 : vector<2x4x1xf32>
    %cst_23 = arith.constant 9.99999974E-6 : f32
    %58 = vector.broadcast %cst_23 : f32 to vector<1x4x1xf32>
    %59 = arith.addf %25, %58 : vector<1x4x1xf32>
    %60 = math.rsqrt %59 : vector<1x4x1xf32>
    %61 = vector.broadcast %54 : vector<1x1x1xf32> to vector<2x4x1xf32>
    %62 = arith.mulf %61, %57 : vector<2x4x1xf32>
    %cst_24 = arith.constant 1.000000e+00 : f32
    %63 = vector.broadcast %cst_24 : f32 to vector<1x1x1xf32>
    %64 = arith.subf %63, %54 : vector<1x1x1xf32>
    %65 = vector.broadcast %64 : vector<1x1x1xf32> to vector<1x4x1xf32>
    %66 = arith.mulf %65, %60 : vector<1x4x1xf32>
    %67 = vector.broadcast %66 : vector<1x4x1xf32> to vector<2x4x1xf32>
    %68 = arith.addf %62, %67 : vector<2x4x1xf32>
    %69 = vector.broadcast %54 : vector<1x1x1xf32> to vector<2x4x1xf32>
    %70 = arith.mulf %69, %57 : vector<2x4x1xf32>
    %71 = arith.mulf %70, %4 : vector<2x4x1xf32>
    %cst_25 = arith.constant 1.000000e+00 : f32
    %72 = vector.broadcast %cst_25 : f32 to vector<1x1x1xf32>
    %73 = arith.subf %72, %54 : vector<1x1x1xf32>
    %74 = vector.broadcast %73 : vector<1x1x1xf32> to vector<1x4x1xf32>
    %75 = arith.mulf %74, %60 : vector<1x4x1xf32>
    %76 = arith.mulf %75, %15 : vector<1x4x1xf32>
    %77 = vector.broadcast %76 : vector<1x4x1xf32> to vector<2x4x1xf32>
    %78 = arith.addf %71, %77 : vector<2x4x1xf32>
    %79 = vector.broadcast %68 : vector<2x4x1xf32> to vector<2x4x256xf32>
    %80 = arith.mulf %0, %79 : vector<2x4x256xf32>
    %81 = vector.broadcast %78 : vector<2x4x1xf32> to vector<2x4x256xf32>
    %82 = arith.subf %80, %81 : vector<2x4x256xf32>
    %c0_26 = arith.constant 0 : index
    %c0_27 = arith.constant 0 : index
    %c0_28 = arith.constant 0 : index
    %83 = vector.load %arg3[%c0_26, %c0_27, %c0_28] : memref<2x4x256xf32, #tpu.memory_space<vmem>>, vector<2x4x256xf32>
    tpu.vector_store %arg3[%c0_26, %c0_27, %c0_28], %82 {strides = array<i32>} : memref<2x4x256xf32, #tpu.memory_space<vmem>>, vector<2x4x256xf32>,
    return
  }
}

</mosaic_0001>

<bundles_post_ra>
// kernel: an_forward.1
= control target key start
LH: loop header
LB: loop body
LE: loop exit
PB: predicated region body
PF: predicated region fallthrough
CT: control target
= control target key end

     0   :  { %8 = vsyncpa [#allocation3], 0  ;;  %s347_s0 = inlined_call_operand.vmem [shape: f32[4], index: 0, kind: input, shape index: {}]   ;;  %s348_s1 = inlined_call_operand.vmem [shape: f32[1,4,1], index: 1, kind: input, shape index: {}]   ;;  %s349_s2 = inlined_call_operand.vmem [shape: f32[2,4,256], index: 2, kind: input, shape index: {}]   ;;  %s350_s3 = inlined_call_operand.vmem [shape: f32[2,4,256], index: 3, kind: output, shape index: {}]  }
   0x1   :  { %s15_s14 = sshll.u32 %s347_s0, 4  ;;  %s16_s14 = int_to_ptr.vmem [resolvable:$true] %s15_s14 }
   0x2   :  { %s242_s15 = scalar_lea.vmem %s16_s14, 16  ;;  %p247_p1 = scmp.lt.s32.totalorder %s16_s14, %s16_s14 }
   0x3   :  { %p243_p0 = scmp.ne.s32.totalorder %s16_s14, %s242_s15  ;;  %p248_p2 = scmp.lt.s32.totalorder %s242_s15, %s242_s15 }
   0x5   :  { %p249_p3 = por %p248_p2, %p247_p1 }
   0x7   :  { %p250_p4 = pnand %p249_p3, %p243_p0 }
   0x9   :  { %253 = shalt.err (!%p250_p4)
}
   0xa   :  { %s256_s16 = smov [#allocation2]  }
   0xb   :  { %18 = dma.vmem_to_smem %s16_s14, 16, %s256_s16, [#allocation3]  }
   0xc   :  { %254 = dma.done.wait [#allocation3], 16  }
   0xd   :  { %255 = vsyncadd [#allocation3], 4294967280 }
   0xe   :  { %26 = sfence }
   0xf   :  { %v285_v0 = vld [vmem:[%s349_s2] sm:$0xff]  ;;  %vm35_vm0 = vcmask 1043456   ;;  %v290_v1 = vld [vmem:[%s349_s2 + $0x8] sm:$0xff]  ;;  %v257_v10 = vmov 839922192   ;;  %v54_v12 = vlaneseq  ;;  %v258_v34 = vmov 0  }
  0x10   :  { %v31_v2 = vcombine.high %v285_v0, %v285_v0  ;;  %v36_v3 = vsel %vm35_vm0, %v285_v0, 0.0  ;;  %v32_v4 = vcombine.high %v290_v1, %v290_v1  ;;  %v41_v6 = vsel %vm35_vm0, %v290_v1, 0.0  ;;  %229 = vset.pattern.permute.xlu1 %v258_v34  ;;  %228 = vset.pattern.permute.xlu0 %v258_v34  ;;  %v105_v35 = vld [vmem:[%s348_s1] sm:$0xf]  ;;  %s223_s21 = sld [smem:[#allocation2 + $0x1]]  ;;  %s224_s1 = sld [smem:[#allocation2 + $0x2]] }
  0x11   :  { %v52_v11 = vunpack.c.l.s4 %v257_v10  ;;  %v55_v14 = vshrl.u32 %v54_v12, 7  ;;  %vm108_vm1 = vcmask 3072   ;;  %vm129_vm2 = vcmask 7168   ;;  %s134_s22 = sld [smem:[#allocation2]] }
  0x12   :  { %v37_v5 = vsel %vm35_vm0, %v31_v2, 0.0  ;;  %v42_v7 = vsel %vm35_vm0, %v32_v4, 0.0 }
  0x13   :  { %v38_v8 = vadd.f32 %v37_v5, %v36_v3  ;;  %v43_v9 = vadd.f32 %v42_v7, %v41_v6  ;;  %v53_v13 = vunpack.c.0.s8 %v52_v11 }
  0x15   :  { %39 = vadd.xlane.f32.xlu0 %v38_v8  ;;  %v302_v15 = vsub.s32 %v53_v13, %v55_v14 }
  0x16   :  { %v124_v52 = vstv %s223_s21  ;;  %v137_v62 = vstv %s224_s1 }
  0x17   :  { %v139_v2 = vstv %s134_s22 }
  0x19   :  { %44 = vadd.xlane.f32.xlu0 %v43_v9 }
  0xa2   :  { %v40_v16 = vpop.xlane.xlu0 %39 }
  0xa3   :  { %v304_v17 = vmul.f32 0.00390625, %v40_v16 }
  0xa5   :  { %v57_v18 = vrot.slane %v304_v17, %v302_v15  ;;  %v106_v37 = vmul.f32 %v105_v35, %v304_v17  ;;  %v89_v9 = vsel %vm35_vm0, %v304_v17, 0.0  ;;  %v94_v10 = vmul.f32 %v304_v17, %v304_v17 }
  0xa6   :  { %v45_v19 = vpop.xlane.xlu0 %44 }
  0xa7   :  { %v308_v20 = vmul.f32 0.00390625, %v45_v19  ;;  %v67_v21 = vsub.f32 %v285_v0, %v57_v18  ;;  %v109_v39 = vsel %vm108_vm1, %v106_v37, 0.0 }
  0xa8   :  { %v110_v41 = vrot.slane %v109_v39, 4 }
  0xa9   :  { %v69_v22 = vmul.f32 %v67_v21, %v67_v21  ;;  %v64_v23 = vrot.slane %v308_v20, %v302_v15  ;;  %v107_v36 = vmul.f32 %v105_v35, %v308_v20  ;;  %v90_v7 = vsel %vm35_vm0, %v308_v20, 0.0 }
  0xaa   :  { %v111_v43 = vadd.f32 %v110_v41, %v109_v39  ;;  %v91_v11 = vadd.f32 %v90_v7, %v89_v9  ;;  %v95_v14 = vmul.f32 %v308_v20, %v308_v20 }
  0xab   :  { %v73_v24 = vcombine.high %v69_v22, %v69_v22  ;;  %v68_v25 = vsub.f32 %v290_v1, %v64_v23  ;;  %v77_v26 = vsel %vm35_vm0, %v69_v22, 0.0  ;;  %v116_v38 = vsel %vm108_vm1, %v107_v36, 0.0 }
  0xac   :  { %v117_v40 = vrot.slane %v116_v38, 4  ;;  %v112_v45 = vrot.slane %v111_v43, 2  ;;  %v93_v19 = vmul.f32 0.5, %v91_v11 }
  0xad   :  { %v78_v27 = vsel %vm35_vm0, %v73_v24, 0.0  ;;  %v70_v28 = vmul.f32 %v68_v25, %v68_v25 }
  0xae   :  { %v79_v29 = vadd.f32 %v78_v27, %v77_v26  ;;  %v118_v42 = vadd.f32 %v117_v40, %v116_v38  ;;  %v113_v47 = vadd.f32 %v112_v45, %v111_v43  ;;  %v102_v25 = vmul.f32 %v93_v19, %v93_v19 }
  0xaf   :  { %v74_v30 = vcombine.high %v70_v28, %v70_v28  ;;  %v82_v31 = vsel %vm35_vm0, %v70_v28, 0.0 }
  0xb0   :  { %80 = vadd.xlane.f32.xlu1 %v79_v29  ;;  %v119_v44 = vrot.slane %v118_v42, 2  ;;  %v114_v49 = vrot.slane %v113_v47, 1 }
  0xb1   :  { %v83_v32 = vsel %vm35_vm0, %v74_v30, 0.0 }
  0xb2   :  { %v84_v33 = vadd.f32 %v83_v32, %v82_v31  ;;  %v120_v46 = vadd.f32 %v119_v44, %v118_v42  ;;  %v115_v51 = vadd.f32 %v114_v49, %v113_v47 }
  0xb4   :  { %85 = vadd.xlane.f32.xlu1 %v84_v33  ;;  %v121_v48 = vrot.slane %v120_v46, 1  ;;  %v125_v54 = vadd.f32 %v124_v52, %v115_v51 }
  0xb6   :  { %v122_v50 = vadd.f32 %v121_v48, %v120_v46  ;;  %v127_v56 = vmax.f32 %v125_v54, 0.0 }
  0xb8   :  { %v126_v53 = vadd.f32 %v124_v52, %v122_v50  ;;  %v130_v58 = vsel %vm129_vm2, %v127_v56, 0.0 }
  0xba   :  { %v128_v55 = vmax.f32 %v126_v53, 0.0 }
  0xbc   :  { %v131_v57 = vsel %vm129_vm2, %v128_v55, 0.0 }
  0xbd   :  { %v132_v59 = vadd.f32 %v131_v57, %v130_v58 }
  0xbf   :  { %v133_v60 = vmul.f32 0.5, %v132_v59 }
  0xc1   :  { %v135_v61 = vmul.f32 0.01, %v133_v60 }
  0xc3   :  { %v138_v63 = vmul.f32 %v137_v62, %v135_v61 }
  0xc5   :  { %v140_v3 = vadd.f32 %v139_v2, %v138_v63 }
  0xc7   :  { %v141_v4 = vsub.f32 0.0, %v140_v3 }
  0xc9   :  { %v142_v5 = vmul.f32 1.442695, %v141_v4 }
  0xcb   :  { %232 = vpow2.f32 %v142_v5 }
  0xd5   :  { %v233_v21 = vpop.eup %232 }
  0xd6   :  { %v144_v27 = vadd.f32 1.0, %v233_v21 }
  0xd8   :  { %234 = vrcp.f32 %v144_v27 }
  0xe2   :  { %v235_v33 = vpop.eup %234 }
  0xe3   :  { %v155_v36 = vsub.f32 1.0, %v235_v33 }
 0x13d   :  { %v81_v6 = vpop.xlane.xlu1 %80 }
 0x13e   :  { %v87_v8 = vmul.f32 0.00390625, %v81_v6 }
 0x140   :  { %v96_v13 = vadd.f32 %v94_v10, %v87_v8  ;;  %v147_v28 = vadd.f32 1e-05, %v87_v8 }
 0x141   :  { %v86_v12 = vpop.xlane.xlu1 %85 }
 0x142   :  { %v88_v16 = vmul.f32 0.00390625, %v86_v12  ;;  %v98_v22 = vsel %vm35_vm0, %v96_v13, 0.0  ;;  %236 = vrsqrt.f32 %v147_v28 }
 0x144   :  { %v97_v18 = vadd.f32 %v95_v14, %v88_v16  ;;  %v148_v30 = vadd.f32 1e-05, %v88_v16 }
 0x146   :  { %v99_v23 = vsel %vm35_vm0, %v97_v18, 0.0  ;;  %238 = vrsqrt.f32 %v148_v30 }
 0x147   :  { %v100_v24 = vadd.f32 %v99_v23, %v98_v22 }
 0x149   :  { %v101_v26 = vmul.f32 0.5, %v100_v24 }
 0x14b   :  { %v103_v29 = vsub.f32 %v101_v26, %v102_v25 }
 0x14c   :  { %v237_v34 = vpop.eup %236 }
 0x14d   :  { %v104_v31 = vmax.f32 %v103_v29, 0.0  ;;  %v153_v40 = vmul.f32 %v237_v34, %v235_v33 }
 0x14f   :  { %v151_v32 = vadd.f32 1e-05, %v104_v31  ;;  %v159_v44 = vmul.f32 %v153_v40, %v304_v17 }
 0x150   :  { %v239_v35 = vpop.eup %238 }
 0x151   :  { %240 = vrsqrt.f32 %v151_v32  ;;  %v154_v38 = vmul.f32 %v239_v35, %v235_v33 }
 0x153   :  { %v160_v46 = vmul.f32 %v154_v38, %v308_v20 }
 0x15b   :  { %v241_v37 = vpop.eup %240 }
 0x15c   :  { %v156_v39 = vmul.f32 %v241_v37, %v155_v36 }
 0x15e   :  { %v158_v41 = vadd.f32 %v156_v39, %v154_v38  ;;  %v157_v42 = vadd.f32 %v156_v39, %v153_v40  ;;  %v161_v43 = vmul.f32 %v156_v39, %v93_v19 }
 0x160   :  { %170 = vperm.xlu1 %229, %v158_v41   ;;  %166 = vperm.xlu0 %228, %v157_v42   ;;  %v162_v45 = vadd.f32 %v161_v43, %v159_v44  ;;  %v163_v47 = vadd.f32 %v161_v43, %v160_v46 }
 0x164   :  { %192 = vperm.xlu1 %229, %v162_v45  }
 0x168   :  { %196 = vperm.xlu1 %229, %v163_v47  }
 0x1df   :  { %v171_v48 = vpop.permute.xlu1 %170  ;;  %v167_v49 = vpop.permute.xlu0 %166 }
 0x1e0   :  { %v178_v50 = vrot.slane %v167_v49, %v302_v15  ;;  %v185_v52 = vrot.slane %v171_v48, %v302_v15 }
 0x1e2   :  { %v188_v53 = vmul.f32 %v178_v50, %v285_v0  ;;  %v189_v17 = vmul.f32 %v185_v52, %v290_v1 }
 0x1e3   :  { %v193_v51 = vpop.permute.xlu1 %192 }
 0x1e4   :  { %v204_v54 = vrot.slane %v193_v51, %v302_v15 }
 0x1e6   :  { %v214_v55 = vsub.f32 %v188_v53, %v204_v54 }
 0x1e7   :  { %v197_v56 = vpop.permute.xlu1 %196 }
 0x1e8   :  { %216 = vst [vmem:[%s350_s3] sm:$0xff] %v214_v55  ;;  %v211_v20 = vrot.slane %v197_v56, %v302_v15 }
 0x1ea   :  { %v215_v57 = vsub.f32 %v189_v17, %v211_v20 }
 0x1ec   :  { %217 = vst [vmem:[%s350_s3 + $0x8] sm:$0xff] %v215_v57 }
 0x1ed   :  { %222 = vsyncpa [#allocation3], 1 }

</bundles_post_ra>
